<compile_context>
chip_gen: v6e
topology: v6e:2x2x1
jax: 0.10.0
libtpu: 0.0.40
codegen_flags: <defaults>
</compile_context>

<pallas_src>
import jax
import jax.numpy as jnp
from jax.experimental import pallas as pl
from jax.experimental.pallas import tpu as pltpu

INPUT_SIZE = 1024
HIDDEN1 = 256
HIDDEN2 = 64
OUTPUT_SIZE = 12
OUT_PAD = 128   # lane-dense padded fc3 width (unmasked store)
TB_CAP = 512    # max batch tile (~85% of measured HBM roofline at 512)


def _round_up(x, m):
    return ((x + m - 1) // m) * m


def mlp_kernel(x_ref, w1_ref, b1_ref, w2_ref, b2_ref, w3_ref, b3_ref, o_ref):
    # x arrives as f32 straight from HBM; cast to bf16 in-kernel (no extra XLA pass).
    x = x_ref[...].astype(jnp.bfloat16)
    # fc1 + relu   (bf16 MXU matmul, f32 accumulation)
    h1 = jnp.dot(x, w1_ref[...], preferred_element_type=jnp.float32)
    h1 = jnp.maximum(h1 + b1_ref[...], 0.0)
    # fc2 + relu
    h2 = jnp.dot(h1.astype(jnp.bfloat16), w2_ref[...],
                 preferred_element_type=jnp.float32)
    h2 = jnp.maximum(h2 + b2_ref[...], 0.0)
    # fc3 (no activation); 128-lane padded output -> unmasked, bf16 store
    out = jnp.dot(h2.astype(jnp.bfloat16), w3_ref[...],
                  preferred_element_type=jnp.float32)
    o_ref[...] = (out + b3_ref[...]).astype(o_ref.dtype)


def prepare_params(w1, b1, w2, b2, w3, b3):
    """One-time parameter preprocessing (hoisted out of the per-call path).

    Weights are (in_features, out_features); biases (out_features,) or
    (1, out_features). Casts weights to bf16 and pads fc3/b3 to a lane-dense
    128-wide output. Call once at setup, not per forward.
    """
    def as_row(b, n):
        return jnp.asarray(b, jnp.float32).reshape(1, n)

    w3p = jnp.zeros((HIDDEN2, OUT_PAD), jnp.float32).at[:, :OUTPUT_SIZE].set(
        jnp.asarray(w3, jnp.float32))
    b3p = jnp.zeros((1, OUT_PAD), jnp.float32).at[:, :OUTPUT_SIZE].set(
        jnp.asarray(b3, jnp.float32).reshape(1, OUTPUT_SIZE))
    return (
        jnp.asarray(w1, jnp.float32).astype(jnp.bfloat16), as_row(b1, HIDDEN1),
        jnp.asarray(w2, jnp.float32).astype(jnp.bfloat16), as_row(b2, HIDDEN2),
        w3p.astype(jnp.bfloat16), b3p,
    )


def _batch_tiling(B):
    """Pick (TB, n_steps): TB a multiple of 8 (f32 sublanes), capped at TB_CAP,
    sized from B to minimize partial-tile waste, and >= 2 grid steps once the
    batch is big enough to shard across v7x's two TensorCores."""
    B8 = _round_up(max(B, 1), 8)
    n_target = 1 if B8 <= 256 else max(2, pl.cdiv(B8, TB_CAP))
    TB = _round_up(pl.cdiv(B8, n_target), 8)
    n_steps = pl.cdiv(B, TB)          # ragged last block handled by Pallas masking
    return TB, n_steps


def mlp_forward(x, params):
    """x: (B, INPUT_SIZE) float32. Returns (B, OUTPUT_SIZE) float32."""
    w1b, b1, w2b, b2, w3b, b3p = params
    B = x.shape[0]
    TB, n_steps = _batch_tiling(B)

    resident = lambda a: pl.BlockSpec(a.shape, lambda i: (0,) * a.ndim)

    out = pl.pallas_call(
        mlp_kernel,
        out_shape=jax.ShapeDtypeStruct((B, OUT_PAD), jnp.bfloat16),
        grid=(n_steps,),
        in_specs=[
            pl.BlockSpec((TB, INPUT_SIZE), lambda i: (i, 0)),
            resident(w1b), resident(b1),
            resident(w2b), resident(b2),
            resident(w3b), resident(b3p),
        ],
        out_specs=pl.BlockSpec((TB, OUT_PAD), lambda i: (i, 0)),
        compiler_params=pltpu.CompilerParams(
            dimension_semantics=("parallel",),
        ),
    )(x, w1b, b1, w2b, b2, w3b, b3p)

    # TODO(synk): for repeated tiny-batch calls, keep the ~0.6 MiB of bf16 weights
    # resident across calls (fuse into a surrounding kernel or use a cross-call
    # semaphore/prefetch pattern) instead of re-DMA'ing them per pallas_call.
    return out[:, :OUTPUT_SIZE].astype(jnp.float32)


def init_linear(key, fan_in, fan_out):
    # Mimic PyTorch nn.Linear default init: U(-1/sqrt(fan_in), 1/sqrt(fan_in)).
    kw, kb = jax.random.split(key)
    bound = 1.0 / jnp.sqrt(fan_in)
    # Stored as (in, out) so the kernel does x @ W directly.
    w = jax.random.uniform(kw, (fan_in, fan_out), jnp.float32, -bound, bound)
    b = jax.random.uniform(kb, (1, fan_out), jnp.float32, -bound, bound)
    return w, b


if __name__ == "__main__":
    key = jax.random.PRNGKey(0)
    kx, k1, k2, k3 = jax.random.split(key, 4)

    batch = 8
    x = jax.random.normal(kx, (batch, INPUT_SIZE), jnp.float32)

    w1, b1 = init_linear(k1, INPUT_SIZE, HIDDEN1)
    w2, b2 = init_linear(k2, HIDDEN1, HIDDEN2)
    w3, b3 = init_linear(k3, HIDDEN2, OUTPUT_SIZE)

    # One-time weight preprocessing (not in the per-call path).
    params = prepare_params(w1, b1, w2, b2, w3, b3)

    fwd = jax.jit(mlp_forward)
    out = jax.block_until_ready(fwd(x, params))

    # Pure-JAX reference with matching bf16-operand / f32-accumulate semantics.
    h = jnp.maximum(
        jnp.dot(x.astype(jnp.bfloat16), w1.astype(jnp.bfloat16),
                preferred_element_type=jnp.float32) + b1, 0.0)
    h = jnp.maximum(
        jnp.dot(h.astype(jnp.bfloat16), w2.astype(jnp.bfloat16),
                preferred_element_type=jnp.float32) + b2, 0.0)
    ref = jnp.dot(h.astype(jnp.bfloat16), w3.astype(jnp.bfloat16),
                  preferred_element_type=jnp.float32) + b3

    assert out.shape == (batch, OUTPUT_SIZE)
    assert jnp.allclose(out, ref, atol=2e-2, rtol=2e-2), \
        float(jnp.max(jnp.abs(out - ref)))

    print("KERNEL_OK")
</pallas_src>

<mosaic_0001>
module attributes {stable_mosaic.version = 11 : i64} {
  func.func @mlp_kernel(%arg0: i32, %arg1: memref<8x1024xf32, #tpu.memory_space<vmem>>, %arg2: memref<1024x256xbf16, #tpu.memory_space<vmem>>, %arg3: memref<1x256xf32, #tpu.memory_space<vmem>>, %arg4: memref<256x64xbf16, #tpu.memory_space<vmem>>, %arg5: memref<1x64xf32, #tpu.memory_space<vmem>>, %arg6: memref<64x128xbf16, #tpu.memory_space<vmem>>, %arg7: memref<1x128xf32, #tpu.memory_space<vmem>>, %arg8: memref<8x128xbf16, #tpu.memory_space<vmem>>) attributes {dimension_semantics = [#tpu.dimension_semantics<parallel>], iteration_bounds = array<i64: 1>, scalar_prefetch = 0 : i64, scratch_operands = 0 : i64, tpu.core_type = #tpu.core_type<tc>, window_params = [{transform_indices = @transform_0, window_bounds = array<i64: 8, 1024>}, {pipeline_mode = #tpu.pipeline_mode<synchronous>, transform_indices = @transform_1, window_bounds = array<i64: 1024, 256>}, {pipeline_mode = #tpu.pipeline_mode<synchronous>, transform_indices = @transform_2, window_bounds = array<i64: 1, 256>}, {pipeline_mode = #tpu.pipeline_mode<synchronous>, transform_indices = @transform_3, window_bounds = array<i64: 256, 64>}, {pipeline_mode = #tpu.pipeline_mode<synchronous>, transform_indices = @transform_4, window_bounds = array<i64: 1, 64>}, {pipeline_mode = #tpu.pipeline_mode<synchronous>, transform_indices = @transform_5, window_bounds = array<i64: 64, 128>}, {pipeline_mode = #tpu.pipeline_mode<synchronous>, transform_indices = @transform_6, window_bounds = array<i64: 1, 128>}, {transform_indices = @transform_7, window_bounds = array<i64: 8, 128>}]} {
    %c0 = arith.constant 0 : index
    %c0_0 = arith.constant 0 : index
    %0 = vector.load %arg1[%c0, %c0_0] : memref<8x1024xf32, #tpu.memory_space<vmem>>, vector<8x1024xf32>
    %1 = arith.truncf %0 : vector<8x1024xf32> to vector<8x1024xbf16>
    %c0_1 = arith.constant 0 : index
    %c0_2 = arith.constant 0 : index
    %2 = vector.load %arg2[%c0_1, %c0_2] : memref<1024x256xbf16, #tpu.memory_space<vmem>>, vector<1024x256xbf16>
    %cst = arith.constant dense<0.000000e+00> : vector<8x256xf32>
    %3 = tpu.matmul %1, %2, %cst {dimension_numbers = #tpu.dot_dimension_numbers<[1], [0], [0], [1], [0, 0, 1, 1], [], []>} : vector<8x1024xbf16>, vector<1024x256xbf16>, vector<8x256xf32> -> vector<8x256xf32>
    %c0_3 = arith.constant 0 : index
    %c0_4 = arith.constant 0 : index
    %4 = vector.load %arg3[%c0_3, %c0_4] : memref<1x256xf32, #tpu.memory_space<vmem>>, vector<1x256xf32>
    %5 = vector.broadcast %4 : vector<1x256xf32> to vector<8x256xf32>
    %6 = arith.addf %3, %5 : vector<8x256xf32>
    %cst_5 = arith.constant 0.000000e+00 : f32
    %7 = vector.broadcast %cst_5 : f32 to vector<8x256xf32>
    %8 = arith.maximumf %6, %7 : vector<8x256xf32>
    %9 = arith.truncf %8 : vector<8x256xf32> to vector<8x256xbf16>
    %c0_6 = arith.constant 0 : index
    %c0_7 = arith.constant 0 : index
    %10 = vector.load %arg4[%c0_6, %c0_7] : memref<256x64xbf16, #tpu.memory_space<vmem>>, vector<256x64xbf16>
    %cst_8 = arith.constant dense<0.000000e+00> : vector<8x64xf32>
    %11 = tpu.matmul %9, %10, %cst_8 {dimension_numbers = #tpu.dot_dimension_numbers<[1], [0], [0], [1], [0, 0, 1, 1], [], []>} : vector<8x256xbf16>, vector<256x64xbf16>, vector<8x64xf32> -> vector<8x64xf32>
    %c0_9 = arith.constant 0 : index
    %c0_10 = arith.constant 0 : index
    %12 = vector.load %arg5[%c0_9, %c0_10] : memref<1x64xf32, #tpu.memory_space<vmem>>, vector<1x64xf32>
    %13 = vector.broadcast %12 : vector<1x64xf32> to vector<8x64xf32>
    %14 = arith.addf %11, %13 : vector<8x64xf32>
    %cst_11 = arith.constant 0.000000e+00 : f32
    %15 = vector.broadcast %cst_11 : f32 to vector<8x64xf32>
    %16 = arith.maximumf %14, %15 : vector<8x64xf32>
    %17 = arith.truncf %16 : vector<8x64xf32> to vector<8x64xbf16>
    %c0_12 = arith.constant 0 : index
    %c0_13 = arith.constant 0 : index
    %18 = vector.load %arg6[%c0_12, %c0_13] : memref<64x128xbf16, #tpu.memory_space<vmem>>, vector<64x128xbf16>
    %cst_14 = arith.constant dense<0.000000e+00> : vector<8x128xf32>
    %19 = tpu.matmul %17, %18, %cst_14 {dimension_numbers = #tpu.dot_dimension_numbers<[1], [0], [0], [1], [0, 0, 1, 1], [], []>} : vector<8x64xbf16>, vector<64x128xbf16>, vector<8x128xf32> -> vector<8x128xf32>
    %c0_15 = arith.constant 0 : index
    %c0_16 = arith.constant 0 : index
    %20 = vector.load %arg7[%c0_15, %c0_16] : memref<1x128xf32, #tpu.memory_space<vmem>>, vector<1x128xf32>
    %21 = vector.broadcast %20 : vector<1x128xf32> to vector<8x128xf32>
    %22 = arith.addf %19, %21 : vector<8x128xf32>
    %23 = arith.truncf %22 : vector<8x128xf32> to vector<8x128xbf16>
    %c0_17 = arith.constant 0 : index
    %c0_18 = arith.constant 0 : index
    %24 = vector.load %arg8[%c0_17, %c0_18] : memref<8x128xbf16, #tpu.memory_space<vmem>>, vector<8x128xbf16>
    tpu.vector_store %arg8[%c0_17, %c0_18], %23 {strides = array<i32>} : memref<8x128xbf16, #tpu.memory_space<vmem>>, vector<8x128xbf16>,
    return
  }
  func.func @transform_0(%arg0: i32) -> (i32, i32) {
    %c0_i32 = arith.constant 0 : i32
    %c0_i32_0 = arith.constant 0 : i32
    return %arg0, %c0_i32 : i32, i32
  }
  func.func @transform_1(%arg0: i32) -> (i32, i32) {
    %c0_i32 = arith.constant 0 : i32
    %c0_i32_0 = arith.constant 0 : i32
    %c0_i32_1 = arith.constant 0 : i32
    return %c0_i32, %c0_i32_0 : i32, i32
  }
  func.func @transform_2(%arg0: i32) -> (i32, i32) {
    %c0_i32 = arith.constant 0 : i32
    %c0_i32_0 = arith.constant 0 : i32
    %c0_i32_1 = arith.constant 0 : i32
    return %c0_i32, %c0_i32_0 : i32, i32
  }
  func.func @transform_3(%arg0: i32) -> (i32, i32) {
    %c0_i32 = arith.constant 0 : i32
    %c0_i32_0 = arith.constant 0 : i32
    %c0_i32_1 = arith.constant 0 : i32
    return %c0_i32, %c0_i32_0 : i32, i32
  }
  func.func @transform_4(%arg0: i32) -> (i32, i32) {
    %c0_i32 = arith.constant 0 : i32
    %c0_i32_0 = arith.constant 0 : i32
    %c0_i32_1 = arith.constant 0 : i32
    return %c0_i32, %c0_i32_0 : i32, i32
  }
  func.func @transform_5(%arg0: i32) -> (i32, i32) {
    %c0_i32 = arith.constant 0 : i32
    %c0_i32_0 = arith.constant 0 : i32
    %c0_i32_1 = arith.constant 0 : i32
    return %c0_i32, %c0_i32_0 : i32, i32
  }
  func.func @transform_6(%arg0: i32) -> (i32, i32) {
    %c0_i32 = arith.constant 0 : i32
    %c0_i32_0 = arith.constant 0 : i32
    %c0_i32_1 = arith.constant 0 : i32
    return %c0_i32, %c0_i32_0 : i32, i32
  }
  func.func @transform_7(%arg0: i32) -> (i32, i32) {
    %c0_i32 = arith.constant 0 : i32
    %c0_i32_0 = arith.constant 0 : i32
    return %arg0, %c0_i32 : i32, i32
  }
}

</mosaic_0001>

<bundles_post_ra>
// kernel: mlp_forward.1
= control target key start
LH: loop header
LB: loop body
LE: loop exit
PB: predicated region body
PF: predicated region fallthrough
CT: control target
= control target key end

     0   :  { %12 = vsyncpa [#allocation3], 0  ;;  %s1701_s24 = smov [#allocation2]   ;;  %s1845_s0 = inlined_call_operand.vmem [shape: f32[8,1024], index: 0, kind: input, shape index: {}]   ;;  %s1846_s1 = inlined_call_operand.hbm [shape: bf16[1024,256], index: 1, kind: input, shape index: {}]   ;;  %s1847_s2 = inlined_call_operand.vmem [shape: f32[1,256], index: 2, kind: input, shape index: {}]   ;;  %s1848_s3 = inlined_call_operand.vmem [shape: bf16[256,64], index: 3, kind: input, shape index: {}]   ;;  %s1849_s4 = inlined_call_operand.vmem [shape: f32[1,64], index: 4, kind: input, shape index: {}]   ;;  %s1850_s5 = inlined_call_operand.vmem [shape: bf16[64,128], index: 5, kind: input, shape index: {}]   ;;  %s1851_s6 = inlined_call_operand.vmem [shape: f32[1,128], index: 6, kind: input, shape index: {}]   ;;  %s1852_s7 = inlined_call_operand.vmem [shape: bf16[8,128], index: 7, kind: output, shape index: {}]  }
   0x1   :  { %s20_s25 = sshll.u32 %s1701_s24, 4  ;;  %s21_s25 = int_to_ptr.vmem [resolvable:$true] %s20_s25 }
   0x2   :  { %s1687_s26 = scalar_lea.vmem %s21_s25, 16384  ;;  %p1692_p1 = scmp.lt.s32.totalorder %s21_s25, %s21_s25 }
   0x3   :  { %p1688_p0 = scmp.ne.s32.totalorder %s21_s25, %s1687_s26  ;;  %p1693_p2 = scmp.lt.s32.totalorder %s1687_s26, %s1687_s26 }
   0x5   :  { %p1694_p3 = por %p1693_p2, %p1692_p1 }
   0x7   :  { %p1695_p4 = pnand %p1694_p3, %p1688_p0 }
   0x9   :  { %1698 = shalt.err (!%p1695_p4)
}
   0xa   :  { %s1702_s27 = smov 128   ;;  %s1703_s28 = smov 8  }
   0xb   :  { %26 = dma.hbm_to_vmem [thread:$0]  %s1846_s1, 16384, %s21_s25, [#allocation3], %s1702_s27, %s1702_s27, %s1703_s28  }
   0xc   :  { %1699 = dma.done.wait [#allocation3], 16384  }
   0xd   :  { %1700 = vsyncadd [#allocation3], 4294950912  ;;  %v1467_v0 = vld [vmem:[#allocation2 + $0x74] ss:$8 sps:$4 sm:$0xff]   ;;  %v1471_v2 = vld [vmem:[#allocation2 + $0x70] ss:$8 sps:$4 sm:$0xff]  }
   0xe   :  { %v1469_v1 = vld [vmem:[#allocation2 + $0x174] ss:$8 sps:$4 sm:$0xff]   ;;  %837 = vmatprep.subr.bf16.mxu0 %v1467_v0  ;;  %v1472_v3 = vld [vmem:[#allocation2 + $0x170] ss:$8 sps:$4 sm:$0xff]   ;;  %v1473_v4 = vld [vmem:[#allocation2 + $0x64] ss:$8 sps:$4 sm:$0xff]  }
   0xf   :  { %878 = vmatprep.subr.bf16.mxu1 %v1469_v1  ;;  %838 = vmatpush1.bf16.msra.mxu0 %v1471_v2  ;;  %v1475_v5 = vld [vmem:[#allocation2 + $0x164] ss:$8 sps:$4 sm:$0xff]   ;;  %v1477_v6 = vld [vmem:[#allocation2 + $0x60] ss:$8 sps:$4 sm:$0xff]   ;;  %v1479_v8 = vld [vmem:[#allocation2 + $0x54] ss:$8 sps:$4 sm:$0xff]  }
  0x10   :  { %879 = vmatpush1.bf16.msra.mxu1 %v1472_v3  ;;  %839 = vmatprep.subr.bf16.mxu0 %v1473_v4  ;;  %v1478_v7 = vld [vmem:[#allocation2 + $0x160] ss:$8 sps:$4 sm:$0xff]   ;;  %v1481_v9 = vld [vmem:[#allocation2 + $0x154] ss:$8 sps:$4 sm:$0xff]   ;;  %v1483_v10 = vld [vmem:[#allocation2 + $0x50] ss:$8 sps:$4 sm:$0xff]  }
  0x11   :  { %880 = vmatprep.subr.bf16.mxu1 %v1475_v5  ;;  %v1484_v11 = vld [vmem:[#allocation2 + $0x150] ss:$8 sps:$4 sm:$0xff]   ;;  %v1485_v12 = vld [vmem:[#allocation2 + $0x44] ss:$8 sps:$4 sm:$0xff]   ;;  %v1489_v14 = vld [vmem:[#allocation2 + $0x40] ss:$8 sps:$4 sm:$0xff]  }
  0x12   :  { %v1487_v13 = vld [vmem:[#allocation2 + $0x144] ss:$8 sps:$4 sm:$0xff]   ;;  %v1490_v15 = vld [vmem:[#allocation2 + $0x140] ss:$8 sps:$4 sm:$0xff]   ;;  %v1491_v16 = vld [vmem:[#allocation2 + $0x34] ss:$8 sps:$4 sm:$0xff]  }
  0x13   :  { %840 = vmatpush1.bf16.msra.mxu0 %v1477_v6  ;;  %v1493_v17 = vld [vmem:[#allocation2 + $0x134] ss:$8 sps:$4 sm:$0xff]   ;;  %v1495_v18 = vld [vmem:[#allocation2 + $0x30] ss:$8 sps:$4 sm:$0xff]   ;;  %v1497_v20 = vld [vmem:[#allocation2 + $0x24] ss:$8 sps:$4 sm:$0xff]  }
  0x14   :  { %881 = vmatpush1.bf16.msra.mxu1 %v1478_v7  ;;  %841 = vmatprep.subr.bf16.mxu0 %v1479_v8  ;;  %v1496_v19 = vld [vmem:[#allocation2 + $0x130] ss:$8 sps:$4 sm:$0xff]   ;;  %v1499_v21 = vld [vmem:[#allocation2 + $0x124] ss:$8 sps:$4 sm:$0xff]   ;;  %v1501_v22 = vld [vmem:[#allocation2 + $0x20] ss:$8 sps:$4 sm:$0xff]  }
  0x15   :  { %882 = vmatprep.subr.bf16.mxu1 %v1481_v9  ;;  %v1502_v23 = vld [vmem:[#allocation2 + $0x120] ss:$8 sps:$4 sm:$0xff]   ;;  %v1503_v24 = vld [vmem:[#allocation2 + $0x14] ss:$8 sps:$4 sm:$0xff]   ;;  %v1507_v26 = vld [vmem:[#allocation2 + $0x10] ss:$8 sps:$4 sm:$0xff]  }
  0x16   :  { %v1505_v25 = vld [vmem:[#allocation2 + $0x114] ss:$8 sps:$4 sm:$0xff]   ;;  %v1508_v27 = vld [vmem:[#allocation2 + $0x110] ss:$8 sps:$4 sm:$0xff]   ;;  %v1509_v28 = vld [vmem:[#allocation2 + $0x4] ss:$8 sps:$4 sm:$0xff]  }
  0x17   :  { %842 = vmatpush1.bf16.msra.mxu0 %v1483_v10  ;;  %v1511_v29 = vld [vmem:[#allocation2 + $0x104] ss:$8 sps:$4 sm:$0xff]   ;;  %v1513_v30 = vld [vmem:[#allocation2] ss:$8 sps:$4 sm:$0xff]   ;;  %v1515_v32 = vld [vmem:[#allocation2 + $0xf4] ss:$8 sps:$4 sm:$0xff]  }
  0x18   :  { %883 = vmatpush1.bf16.msra.mxu1 %v1484_v11  ;;  %843 = vmatprep.subr.bf16.mxu0 %v1485_v12  ;;  %v1514_v31 = vld [vmem:[#allocation2 + $0x100] ss:$8 sps:$4 sm:$0xff]   ;;  %v1517_v33 = vld [vmem:[#allocation2 + $0x1f4] ss:$8 sps:$4 sm:$0xff]   ;;  %v1519_v34 = vld [vmem:[#allocation2 + $0xf0] ss:$8 sps:$4 sm:$0xff]  }
  0x19   :  { %884 = vmatprep.subr.bf16.mxu1 %v1487_v13  ;;  %v1520_v35 = vld [vmem:[#allocation2 + $0x1f0] ss:$8 sps:$4 sm:$0xff]   ;;  %v1521_v36 = vld [vmem:[#allocation2 + $0xe4] ss:$8 sps:$4 sm:$0xff]   ;;  %v1525_v38 = vld [vmem:[#allocation2 + $0xe0] ss:$8 sps:$4 sm:$0xff]  }
  0x1a   :  { %v1523_v37 = vld [vmem:[#allocation2 + $0x1e4] ss:$8 sps:$4 sm:$0xff]   ;;  %v1526_v39 = vld [vmem:[#allocation2 + $0x1e0] ss:$8 sps:$4 sm:$0xff]   ;;  %v1527_v40 = vld [vmem:[#allocation2 + $0xd4] ss:$8 sps:$4 sm:$0xff]  }
  0x1b   :  { %844 = vmatpush1.bf16.msra.mxu0 %v1489_v14  ;;  %v1529_v41 = vld [vmem:[#allocation2 + $0x1d4] ss:$8 sps:$4 sm:$0xff]   ;;  %v1531_v42 = vld [vmem:[#allocation2 + $0xd0] ss:$8 sps:$4 sm:$0xff]   ;;  %v1533_v44 = vld [vmem:[#allocation2 + $0xc4] ss:$8 sps:$4 sm:$0xff]  }
  0x1c   :  { %885 = vmatpush1.bf16.msra.mxu1 %v1490_v15  ;;  %845 = vmatprep.subr.bf16.mxu0 %v1491_v16  ;;  %v1532_v43 = vld [vmem:[#allocation2 + $0x1d0] ss:$8 sps:$4 sm:$0xff]   ;;  %v1535_v45 = vld [vmem:[#allocation2 + $0x1c4] ss:$8 sps:$4 sm:$0xff]   ;;  %v1537_v47 = vld [vmem:[#allocation2 + $0xc0] ss:$8 sps:$4 sm:$0xff]  }
  0x1d   :  { %886 = vmatprep.subr.bf16.mxu1 %v1493_v17  ;;  %v42_v46 = vld [vmem:[%s1845_s0 + $0x8] sm:$0xff]  ;;  %v44_v50 = vld [vmem:[%s1845_s0 + $0x18] sm:$0xff]  ;;  %v41_v4 = vld [vmem:[%s1845_s0] sm:$0xff]  ;;  %vm1705_vm0 = vmmov 0   ;;  %vm1221_vm1 = vcmask 523264  }
  0x1e   :  { %v1538_v48 = vld [vmem:[#allocation2 + $0x1c0] ss:$8 sps:$4 sm:$0xff]   ;;  %v50_v49 = vpack.c.bf16 %v42_v46, %v42_v46  ;;  %v1539_v51 = vld [vmem:[#allocation2 + $0xb4] ss:$8 sps:$4 sm:$0xff]   ;;  %v52_v52 = vpack.c.bf16 %v44_v50, %v44_v50  ;;  %v1543_v54 = vld [vmem:[#allocation2 + $0xb0] ss:$8 sps:$4 sm:$0xff]   ;;  %v49_v8 = vpack.c.bf16 %v41_v4, %v41_v4 }
  0x1f   :  { %846 = vmatpush1.bf16.msra.mxu0 %v1495_v18  ;;  %v1541_v53 = vld [vmem:[#allocation2 + $0x1b4] ss:$8 sps:$4 sm:$0xff]   ;;  %v1544_v55 = vld [vmem:[#allocation2 + $0x1b0] ss:$8 sps:$4 sm:$0xff]   ;;  %v1545_v56 = vld [vmem:[#allocation2 + $0xa4] ss:$8 sps:$4 sm:$0xff]  }
  0x20   :  { %887 = vmatpush1.bf16.msra.mxu1 %v1496_v19  ;;  %847 = vmatprep.subr.bf16.mxu0 %v1497_v20  ;;  %v1547_v57 = vld [vmem:[#allocation2 + $0x1a4] ss:$8 sps:$4 sm:$0xff]   ;;  %v1549_v58 = vld [vmem:[#allocation2 + $0xa0] ss:$8 sps:$4 sm:$0xff]   ;;  %v1551_v60 = vld [vmem:[#allocation2 + $0x94] ss:$8 sps:$4 sm:$0xff]  }
  0x21   :  { %888 = vmatprep.subr.bf16.mxu1 %v1499_v21  ;;  %869 = vmatprep.mubr.bf16.mxu0 %v50_v49  ;;  %v1550_v59 = vld [vmem:[#allocation2 + $0x1a0] ss:$8 sps:$4 sm:$0xff]   ;;  %v1553_v61 = vld [vmem:[#allocation2 + $0x194] ss:$8 sps:$4 sm:$0xff]   ;;  %v1555_v62 = vld [vmem:[#allocation2 + $0x90] ss:$8 sps:$4 sm:$0xff]  }
  0x22   :  { %910 = vmatprep.mubr.bf16.mxu1 %v52_v52  ;;  %v1556_v63 = vld [vmem:[#allocation2 + $0x190] ss:$8 sps:$4 sm:$0xff]   ;;  %v1557_v0 = vld [vmem:[#allocation2 + $0x84] ss:$8 sps:$4 sm:$0xff]   ;;  %v1561_v2 = vld [vmem:[#allocation2 + $0x80] ss:$8 sps:$4 sm:$0xff]  }
  0x23   :  { %848 = vmatpush1.bf16.msra.mxu0 %v1501_v22  ;;  %v1559_v1 = vld [vmem:[#allocation2 + $0x184] ss:$8 sps:$4 sm:$0xff]   ;;  %v1562_v3 = vld [vmem:[#allocation2 + $0x180] ss:$8 sps:$4 sm:$0xff]   ;;  %v43_v5 = vld [vmem:[%s1845_s0 + $0x10] sm:$0xff] }
  0x24   :  { %889 = vmatpush1.bf16.msra.mxu1 %v1502_v23  ;;  %849 = vmatprep.subr.bf16.mxu0 %v1503_v24  ;;  %v1565_v6 = vld [vmem:[#allocation2 + $0x274] ss:$8 sps:$4 sm:$0xff]   ;;  %v51_v9 = vpack.c.bf16 %v43_v5, %v43_v5  ;;  %v1563_v10 = vld [vmem:[#allocation2 + $0x270] ss:$8 sps:$4 sm:$0xff]   ;;  %v1571_v12 = vld [vmem:[#allocation2 + $0x264] ss:$8 sps:$4 sm:$0xff]  }
  0x25   :  { %890 = vmatprep.subr.bf16.mxu1 %v1505_v25  ;;  %v1568_v7 = vld [vmem:[#allocation2 + $0x374] ss:$8 sps:$4 sm:$0xff]   ;;  %v1566_v11 = vld [vmem:[#allocation2 + $0x370] ss:$8 sps:$4 sm:$0xff]   ;;  %v1574_v13 = vld [vmem:[#allocation2 + $0x364] ss:$8 sps:$4 sm:$0xff]  }
  0x26   :  { %v1569_v14 = vld [vmem:[#allocation2 + $0x260] ss:$8 sps:$4 sm:$0xff]   ;;  %v1577_v16 = vld [vmem:[#allocation2 + $0x254] ss:$8 sps:$4 sm:$0xff]   ;;  %v1575_v18 = vld [vmem:[#allocation2 + $0x250] ss:$8 sps:$4 sm:$0xff]  }
  0x27   :  { %850 = vmatpush1.bf16.msra.mxu0 %v1507_v26  ;;  %v1572_v15 = vld [vmem:[#allocation2 + $0x360] ss:$8 sps:$4 sm:$0xff]   ;;  %v1580_v17 = vld [vmem:[#allocation2 + $0x354] ss:$8 sps:$4 sm:$0xff]   ;;  %v1578_v19 = vld [vmem:[#allocation2 + $0x350] ss:$8 sps:$4 sm:$0xff]  }
  0x28   :  { %891 = vmatpush1.bf16.msra.mxu1 %v1508_v27  ;;  %851 = vmatprep.subr.bf16.mxu0 %v1509_v28  ;;  %v1583_v20 = vld [vmem:[#allocation2 + $0x244] ss:$8 sps:$4 sm:$0xff]   ;;  %v1581_v22 = vld [vmem:[#allocation2 + $0x240] ss:$8 sps:$4 sm:$0xff]   ;;  %v1589_v24 = vld [vmem:[#allocation2 + $0x234] ss:$8 sps:$4 sm:$0xff]  }
  0x29   :  { %892 = vmatprep.subr.bf16.mxu1 %v1511_v29  ;;  %v1586_v21 = vld [vmem:[#allocation2 + $0x344] ss:$8 sps:$4 sm:$0xff]   ;;  %v1584_v23 = vld [vmem:[#allocation2 + $0x340] ss:$8 sps:$4 sm:$0xff]   ;;  %v1592_v25 = vld [vmem:[#allocation2 + $0x334] ss:$8 sps:$4 sm:$0xff]  }
  0x2a   :  { %v1587_v26 = vld [vmem:[#allocation2 + $0x230] ss:$8 sps:$4 sm:$0xff]   ;;  %v1595_v28 = vld [vmem:[#allocation2 + $0x224] ss:$8 sps:$4 sm:$0xff]   ;;  %v1617_v50 = vld [vmem:[#allocation2 + $0x2e0] ss:$8 sps:$4 sm:$0xff]  }
  0x2b   :  { %852 = vmatpush1.bf16.msra.mxu0 %v1513_v30  ;;  %v1590_v27 = vld [vmem:[#allocation2 + $0x330] ss:$8 sps:$4 sm:$0xff]   ;;  %v1598_v29 = vld [vmem:[#allocation2 + $0x324] ss:$8 sps:$4 sm:$0xff]   ;;  %v1593_v30 = vld [vmem:[#allocation2 + $0x220] ss:$8 sps:$4 sm:$0xff]  }
  0x2c   :  { %893 = vmatpush1.bf16.msra.mxu1 %v1514_v31  ;;  %853 = vmatprep.subr.bf16.mxu0 %v1515_v32  ;;  %v1596_v31 = vld [vmem:[#allocation2 + $0x320] ss:$8 sps:$4 sm:$0xff]   ;;  %v1601_v32 = vld [vmem:[#allocation2 + $0x214] ss:$8 sps:$4 sm:$0xff]   ;;  %v1611_v46 = vld [vmem:[#allocation2 + $0x2f0] ss:$8 sps:$4 sm:$0xff]  }
  0x2d   :  { %894 = vmatprep.subr.bf16.mxu1 %v1517_v33  ;;  %v1604_v33 = vld [vmem:[#allocation2 + $0x314] ss:$8 sps:$4 sm:$0xff]   ;;  %v1622_v49 = vld [vmem:[#allocation2 + $0x3e4] ss:$8 sps:$4 sm:$0xff]  }
  0x2e   :  { %v1625_v52 = vld [vmem:[#allocation2 + $0x2d4] ss:$8 sps:$4 sm:$0xff]  }
  0x2f   :  { %854 = vmatpush2.bf16.msra.mxu0 %v1519_v34  ;;  %v1599_v34 = vld [vmem:[#allocation2 + $0x210] ss:$8 sps:$4 sm:$0xff]   ;;  %v1649_v4 = vld [vmem:[#allocation2 + $0x294] ss:$8 sps:$4 sm:$0xff]  }
  0x30   :  { %895 = vmatpush2.bf16.msra.mxu1 %v1520_v35  ;;  %855 = vmatprep.subr.bf16.mxu0 %v1521_v36  ;;  %v46_v35 = vld [vmem:[%s1845_s0 + $0x28] sm:$0xff]  ;;  %v1602_v36 = vld [vmem:[#allocation2 + $0x310] ss:$8 sps:$4 sm:$0xff]   ;;  %v1652_v5 = vld [vmem:[#allocation2 + $0x394] ss:$8 sps:$4 sm:$0xff]  }
  0x31   :  { %896 = vmatprep.subr.bf16.mxu1 %v1523_v37  ;;  %v1607_v37 = vld [vmem:[#allocation2 + $0x204] ss:$8 sps:$4 sm:$0xff]  }
  0x33   :  { %856 = vmatpush2.bf16.msra.mxu0 %v1525_v38  ;;  %v54_v38 = vpack.c.bf16 %v46_v35, %v46_v35 }
  0x34   :  { %897 = vmatpush2.bf16.msra.mxu1 %v1526_v39  ;;  %857 = vmatprep.subr.bf16.mxu0 %v1527_v40  ;;  %v48_v39 = vld [vmem:[%s1845_s0 + $0x38] sm:$0xff]  ;;  %v1610_v40 = vld [vmem:[#allocation2 + $0x304] ss:$8 sps:$4 sm:$0xff]  }
  0x35   :  { %898 = vmatprep.subr.bf16.mxu1 %v1529_v41  ;;  %v56_v41 = vpack.c.bf16 %v48_v39, %v48_v39 }
  0x37   :  { %858 = vmatpush2.bf16.msra.mxu0 %v1531_v42  ;;  %v1605_v42 = vld [vmem:[#allocation2 + $0x200] ss:$8 sps:$4 sm:$0xff]  }
  0x38   :  { %899 = vmatpush2.bf16.msra.mxu1 %v1532_v43  ;;  %859 = vmatprep.subr.bf16.mxu0 %v1533_v44  ;;  %v1608_v43 = vld [vmem:[#allocation2 + $0x300] ss:$8 sps:$4 sm:$0xff]   ;;  %v1613_v44 = vld [vmem:[#allocation2 + $0x2f4] ss:$8 sps:$4 sm:$0xff]  }
  0x39   :  { %900 = vmatprep.subr.bf16.mxu1 %v1535_v45  ;;  %v1616_v45 = vld [vmem:[#allocation2 + $0x3f4] ss:$8 sps:$4 sm:$0xff]  }
  0x3b   :  { %860 = vmatpush2.bf16.msra.mxu0 %v1537_v47  ;;  %v1614_v47 = vld [vmem:[#allocation2 + $0x3f0] ss:$8 sps:$4 sm:$0xff]  }
  0x3c   :  { %901 = vmatpush2.bf16.msra.mxu1 %v1538_v48  ;;  %861 = vmatprep.subr.bf16.mxu0 %v1539_v51  ;;  %v1619_v48 = vld [vmem:[#allocation2 + $0x2e4] ss:$8 sps:$4 sm:$0xff]   ;;  %v1620_v51 = vld [vmem:[#allocation2 + $0x3e0] ss:$8 sps:$4 sm:$0xff]  }
  0x3d   :  { %902 = vmatprep.subr.bf16.mxu1 %v1541_v53  ;;  %v1628_v53 = vld [vmem:[#allocation2 + $0x3d4] ss:$8 sps:$4 sm:$0xff]  }
  0x3f   :  { %862 = vmatpush2.bf16.msra.mxu0 %v1543_v54  ;;  %v1623_v54 = vld [vmem:[#allocation2 + $0x2d0] ss:$8 sps:$4 sm:$0xff]  }
  0x40   :  { %903 = vmatpush2.bf16.msra.mxu1 %v1544_v55  ;;  %863 = vmatprep.subr.bf16.mxu0 %v1545_v56  ;;  %v1626_v55 = vld [vmem:[#allocation2 + $0x3d0] ss:$8 sps:$4 sm:$0xff]   ;;  %v1631_v56 = vld [vmem:[#allocation2 + $0x2c4] ss:$8 sps:$4 sm:$0xff]  }
  0x41   :  { %904 = vmatprep.subr.bf16.mxu1 %v1547_v57  ;;  %v1634_v57 = vld [vmem:[#allocation2 + $0x3c4] ss:$8 sps:$4 sm:$0xff]  }
  0x43   :  { %864 = vmatpush2.bf16.msra.mxu0 %v1549_v58  ;;  %v1629_v58 = vld [vmem:[#allocation2 + $0x2c0] ss:$8 sps:$4 sm:$0xff]  }
  0x44   :  { %905 = vmatpush2.bf16.msra.mxu1 %v1550_v59  ;;  %865 = vmatprep.subr.bf16.mxu0 %v1551_v60  ;;  %v1632_v59 = vld [vmem:[#allocation2 + $0x3c0] ss:$8 sps:$4 sm:$0xff]   ;;  %v1637_v60 = vld [vmem:[#allocation2 + $0x2b4] ss:$8 sps:$4 sm:$0xff]  }
  0x45   :  { %906 = vmatprep.subr.bf16.mxu1 %v1553_v61  ;;  %v1640_v61 = vld [vmem:[#allocation2 + $0x3b4] ss:$8 sps:$4 sm:$0xff]  }
  0x47   :  { %866 = vmatpush2.bf16.msra.mxu0 %v1555_v62  ;;  %v1635_v62 = vld [vmem:[#allocation2 + $0x2b0] ss:$8 sps:$4 sm:$0xff]  }
  0x48   :  { %907 = vmatpush2.bf16.msra.mxu1 %v1556_v63  ;;  %867 = vmatprep.subr.bf16.mxu0 %v1557_v0  ;;  %v1638_v63 = vld [vmem:[#allocation2 + $0x3b0] ss:$8 sps:$4 sm:$0xff]   ;;  %v1643_v0 = vld [vmem:[#allocation2 + $0x2a4] ss:$8 sps:$4 sm:$0xff]  }
  0x49   :  { %908 = vmatprep.subr.bf16.mxu1 %v1559_v1  ;;  %v1646_v1 = vld [vmem:[#allocation2 + $0x3a4] ss:$8 sps:$4 sm:$0xff]  }
  0x4b   :  { %868 = vmatpush2.bf16.msra.mxu0 %v1561_v2  ;;  %v1641_v2 = vld [vmem:[#allocation2 + $0x2a0] ss:$8 sps:$4 sm:$0xff]  }
  0x4c   :  { %909 = vmatpush2.bf16.msra.mxu1 %v1562_v3  ;;  %919 = vmatprep.subr.bf16.mxu0 %v1565_v6  ;;  %v1644_v3 = vld [vmem:[#allocation2 + $0x3a0] ss:$8 sps:$4 sm:$0xff]   ;;  %v1647_v6 = vld [vmem:[#allocation2 + $0x290] ss:$8 sps:$4 sm:$0xff]  }
  0x4d   :  { %960 = vmatprep.subr.bf16.mxu1 %v1568_v7  ;;  %v1650_v7 = vld [vmem:[#allocation2 + $0x390] ss:$8 sps:$4 sm:$0xff]  }
  0x4e   :  { %870 = vmatmul.mubr.bf16.vlgmr.msra.gmra.mxu0 %v49_v8  ;;  %v1655_v8 = vld [vmem:[#allocation2 + $0x284] ss:$8 sps:$4 sm:$0xff]  }
  0x4f   :  { %911 = vmatmul.mubr.bf16.vlgmr.msra.gmra.mxu1 %v51_v9  ;;  %920 = vmatpush1.bf16.msra.mxu0 %v1563_v10  ;;  %v1658_v9 = vld [vmem:[#allocation2 + $0x384] ss:$8 sps:$4 sm:$0xff]   ;;  %v1653_v10 = vld [vmem:[#allocation2 + $0x280] ss:$8 sps:$4 sm:$0xff]  }
  0x50   :  { %961 = vmatpush1.bf16.msra.mxu1 %v1566_v11  ;;  %921 = vmatprep.subr.bf16.mxu0 %v1571_v12  ;;  %v1656_v11 = vld [vmem:[#allocation2 + $0x380] ss:$8 sps:$4 sm:$0xff]  }
  0x51   :  { %962 = vmatprep.subr.bf16.mxu1 %v1574_v13  ;;  %951 = vmatprep.mubr.bf16.mxu0 %v54_v38  ;;  %v45_v12 = vld [vmem:[%s1845_s0 + $0x20] sm:$0xff]  ;;  %v47_v13 = vld [vmem:[%s1845_s0 + $0x30] sm:$0xff] }
  0x52   :  { %992 = vmatprep.mubr.bf16.mxu1 %v56_v41 }
  0x53   :  { %922 = vmatpush1.bf16.msra.mxu0 %v1569_v14  ;;  %v53_v14 = vpack.c.bf16 %v45_v12, %v45_v12 }
  0x54   :  { %963 = vmatpush1.bf16.msra.mxu1 %v1572_v15  ;;  %923 = vmatprep.subr.bf16.mxu0 %v1577_v16  ;;  %v55_v15 = vpack.c.bf16 %v47_v13, %v47_v13  ;;  %v1659_v16 = vld [vmem:[%s1848_s3 + $0x78] sm:$0xff]  }
  0x55   :  { %964 = vmatprep.subr.bf16.mxu1 %v1580_v17  ;;  %v1660_v17 = vld [vmem:[%s1848_s3 + $0x38] sm:$0xff]  }
  0x57   :  { %924 = vmatpush1.bf16.msra.mxu0 %v1575_v18  ;;  %v1661_v18 = vld [vmem:[%s1848_s3 + $0x70] sm:$0xff]  }
  0x58   :  { %965 = vmatpush1.bf16.msra.mxu1 %v1578_v19  ;;  %925 = vmatprep.subr.bf16.mxu0 %v1583_v20  ;;  %v1662_v19 = vld [vmem:[%s1848_s3 + $0x30] sm:$0xff]   ;;  %v1663_v20 = vld [vmem:[%s1848_s3 + $0x68] sm:$0xff]  }
  0x59   :  { %966 = vmatprep.subr.bf16.mxu1 %v1586_v21  ;;  %v1664_v21 = vld [vmem:[%s1848_s3 + $0x28] sm:$0xff]  }
  0x5b   :  { %926 = vmatpush1.bf16.msra.mxu0 %v1581_v22  ;;  %v1665_v22 = vld [vmem:[%s1848_s3 + $0x60] sm:$0xff]  }
  0x5c   :  { %967 = vmatpush1.bf16.msra.mxu1 %v1584_v23  ;;  %927 = vmatprep.subr.bf16.mxu0 %v1589_v24  ;;  %v1666_v23 = vld [vmem:[%s1848_s3 + $0x20] sm:$0xff]   ;;  %v1667_v24 = vld [vmem:[%s1848_s3 + $0x58] sm:$0xff]  }
  0x5d   :  { %968 = vmatprep.subr.bf16.mxu1 %v1592_v25  ;;  %v1668_v25 = vld [vmem:[%s1848_s3 + $0x18] sm:$0xff]  }
  0x5f   :  { %928 = vmatpush1.bf16.msra.mxu0 %v1587_v26  ;;  %v1669_v26 = vld [vmem:[%s1848_s3 + $0x50] sm:$0xff]  }
  0x60   :  { %969 = vmatpush1.bf16.msra.mxu1 %v1590_v27  ;;  %929 = vmatprep.subr.bf16.mxu0 %v1595_v28  ;;  %v1670_v27 = vld [vmem:[%s1848_s3 + $0x10] sm:$0xff]   ;;  %v1671_v28 = vld [vmem:[%s1848_s3 + $0x48] sm:$0xff]  }
  0x61   :  { %970 = vmatprep.subr.bf16.mxu1 %v1598_v29  ;;  %v1672_v29 = vld [vmem:[%s1848_s3 + $0x8] sm:$0xff]  }
  0x63   :  { %930 = vmatpush1.bf16.msra.mxu0 %v1593_v30  ;;  %v1673_v30 = vld [vmem:[%s1848_s3 + $0x40] sm:$0xff]  }
  0x64   :  { %971 = vmatpush1.bf16.msra.mxu1 %v1596_v31  ;;  %931 = vmatprep.subr.bf16.mxu0 %v1601_v32  ;;  %v1674_v31 = vld [vmem:[%s1848_s3] sm:$0xff]   ;;  %v1675_v32 = vld [vmem:[%s1850_s5 + $0x18] sm:$0xff]  }
  0x65   :  { %972 = vmatprep.subr.bf16.mxu1 %v1604_v33  ;;  %v1704_v33 = vmov 0.0  }
  0x67   :  { %932 = vmatpush1.bf16.msra.mxu0 %v1599_v34 }
  0x68   :  { %973 = vmatpush1.bf16.msra.mxu1 %v1602_v36  ;;  %933 = vmatprep.subr.bf16.mxu0 %v1607_v37 }
  0x69   :  { %974 = vmatprep.subr.bf16.mxu1 %v1610_v40 }
  0x6b   :  { %934 = vmatpush1.bf16.msra.mxu0 %v1605_v42  ;;  %v187_v42 = vlaneseq }
  0x6c   :  { %975 = vmatpush1.bf16.msra.mxu1 %v1608_v43  ;;  %935 = vmatprep.subr.bf16.mxu0 %v1613_v44 }
  0x6d   :  { %976 = vmatprep.subr.bf16.mxu1 %v1616_v45  ;;  %v188_v43 = vshrl.u32 %v187_v42, 7  ;;  %v185_v45 = vld [vmem:[%s1847_s2] sm:$0x3] }
  0x6f   :  { %936 = vmatpush2.bf16.msra.mxu0 %v1611_v46  ;;  %v189_v44 = vsub.s32 0, %v188_v43  ;;  %v193_v46 = vsub.s32 1, %v188_v43 }
  0x70   :  { %977 = vmatpush2.bf16.msra.mxu1 %v1614_v47  ;;  %937 = vmatprep.subr.bf16.mxu0 %v1619_v48 }
  0x71   :  { %978 = vmatprep.subr.bf16.mxu1 %v1622_v49  ;;  %v190_v47 = vrot.slane %v185_v45, %v189_v44  ;;  %v194_v48 = vrot.slane %v185_v45, %v193_v46 }
  0x73   :  { %938 = vmatpush2.bf16.msra.mxu0 %v1617_v50 }
  0x74   :  { %979 = vmatpush2.bf16.msra.mxu1 %v1620_v51  ;;  %939 = vmatprep.subr.bf16.mxu0 %v1625_v52 }
  0x75   :  { %980 = vmatprep.subr.bf16.mxu1 %v1628_v53 }
  0x77   :  { %940 = vmatpush2.bf16.msra.mxu0 %v1623_v54 }
  0x78   :  { %981 = vmatpush2.bf16.msra.mxu1 %v1626_v55  ;;  %941 = vmatprep.subr.bf16.mxu0 %v1631_v56 }
  0x79   :  { %982 = vmatprep.subr.bf16.mxu1 %v1634_v57 }
  0x7b   :  { %942 = vmatpush2.bf16.msra.mxu0 %v1629_v58 }
  0x7c   :  { %983 = vmatpush2.bf16.msra.mxu1 %v1632_v59  ;;  %943 = vmatprep.subr.bf16.mxu0 %v1637_v60 }
  0x7d   :  { %984 = vmatprep.subr.bf16.mxu1 %v1640_v61 }
  0x7f   :  { %944 = vmatpush2.bf16.msra.mxu0 %v1635_v62 }
  0x80   :  { %985 = vmatpush2.bf16.msra.mxu1 %v1638_v63  ;;  %945 = vmatprep.subr.bf16.mxu0 %v1643_v0 }
  0x81   :  { %986 = vmatprep.subr.bf16.mxu1 %v1646_v1 }
  0x83   :  { %946 = vmatpush2.bf16.msra.mxu0 %v1641_v2 }
  0x84   :  { %987 = vmatpush2.bf16.msra.mxu1 %v1644_v3  ;;  %947 = vmatprep.subr.bf16.mxu0 %v1649_v4 }
  0x85   :  { %988 = vmatprep.subr.bf16.mxu1 %v1652_v5  ;;  %v1676_v5 = vld [vmem:[%s1850_s5 + $0x10] sm:$0xff]  }
  0x87   :  { %948 = vmatpush2.bf16.msra.mxu0 %v1647_v6  ;;  %v1677_v6 = vld [vmem:[%s1850_s5 + $0x8] sm:$0xff]  }
  0x88   :  { %989 = vmatpush2.bf16.msra.mxu1 %v1650_v7  ;;  %949 = vmatprep.subr.bf16.mxu0 %v1655_v8  ;;  %v1678_v7 = vld [vmem:[%s1850_s5] sm:$0xff]  }
  0x89   :  { %990 = vmatprep.subr.bf16.mxu1 %v1658_v9  ;;  %v1400_v9 = vld [vmem:[%s1849_s4] ss:$0 sm:$0xff] }
  0x8b   :  { %950 = vmatpush2.bf16.msra.mxu0 %v1653_v10 }
  0x8c   :  { %991 = vmatpush2.bf16.msra.mxu1 %v1656_v11  ;;  %1423 = vmatprep.subr.bf16.mxu0 %v1659_v16 }
  0x8d   :  { %1450 = vmatprep.subr.bf16.mxu1 %v1704_v33 }
  0x8e   :  { %952 = vmatmul.mubr.bf16.vlgmr.msra.gmra.mxu0 %v53_v14 }
  0x8f   :  { %993 = vmatmul.mubr.bf16.vlgmr.msra.gmra.mxu1 %v55_v15  ;;  %1424 = vmatpush3.bf16.msra.mxu0 %v1660_v17  ;;  %v1417_v17 = vld [vmem:[%s1851_s6] ss:$0 sm:$0xff] }
  0x90   :  { %1425 = vmatprep.subr.bf16.mxu0 %v1661_v18  ;;  %1451 = vmatpush3.bf16.msra.mxu1 %v1675_v32 }
  0x91   :  { %1452 = vmatprep.subr.bf16.mxu1 %v1704_v33  ;;  %1458 = vmatprep.mubr.msk.bf16.mxu1 %vm1705_vm0, %v1704_v33 }
  0x93   :  { %1426 = vmatpush3.bf16.msra.mxu0 %v1662_v19 }
  0x94   :  { %1427 = vmatprep.subr.bf16.mxu0 %v1663_v20  ;;  %1453 = vmatpush3.bf16.msra.mxu1 %v1676_v5 }
  0x95   :  { %1454 = vmatprep.subr.bf16.mxu1 %v1704_v33 }
  0x97   :  { %1428 = vmatpush3.bf16.msra.mxu0 %v1664_v21 }
  0x98   :  { %1429 = vmatprep.subr.bf16.mxu0 %v1665_v22  ;;  %1455 = vmatpush3.bf16.msra.mxu1 %v1677_v6 }
  0x99   :  { %1456 = vmatprep.subr.bf16.mxu1 %v1704_v33 }
  0x9b   :  { %1430 = vmatpush3.bf16.msra.mxu0 %v1666_v23 }
  0x9c   :  { %1431 = vmatprep.subr.bf16.mxu0 %v1667_v24  ;;  %1457 = vmatpush3.bf16.msra.mxu1 %v1678_v7 }
  0x9f   :  { %1432 = vmatpush3.bf16.msra.mxu0 %v1668_v25 }
  0xa0   :  { %1433 = vmatprep.subr.bf16.mxu0 %v1669_v26 }
  0xa3   :  { %1434 = vmatpush3.bf16.msra.mxu0 %v1670_v27 }
  0xa4   :  { %1435 = vmatprep.subr.bf16.mxu0 %v1671_v28 }
  0xa7   :  { %1436 = vmatpush3.bf16.msra.mxu0 %v1672_v29 }
  0xa8   :  { %1437 = vmatprep.subr.bf16.mxu0 %v1673_v30 }
  0xab   :  { %1438 = vmatpush3.bf16.msra.mxu0 %v1674_v31 }
 0x10e   :  { %v871_v34 = vpop.f32.mrf.mxu0 }
 0x10f   :  { %v912_v35 = vpop.f32.mrf.mxu1  ;;  %v872_v49 = vadd.f32 %v871_v34, %v190_v47 }
 0x110   :  { %v873_v36 = vpop.f32.mrf.mxu0 }
 0x111   :  { %v914_v37 = vpop.f32.mrf.mxu1  ;;  %v874_v50 = vadd.f32 %v873_v36, %v194_v48  ;;  %v913_v51 = vadd.f32 %v912_v35, %v872_v49 }
 0x112   :  { %v875_v38 = vpop.f32.mrf.mxu0 }
 0x113   :  { %v916_v39 = vpop.f32.mrf.mxu1  ;;  %v915_v54 = vadd.f32 %v914_v37, %v874_v50 }
 0x114   :  { %v876_v40 = vpop.f32.mrf.mxu0 }
 0x115   :  { %v917_v41 = vpop.f32.mrf.mxu1 }
 0x14e   :  { %v953_v52 = vpop.f32.mrf.mxu0 }
 0x14f   :  { %v994_v53 = vpop.f32.mrf.mxu1  ;;  %v954_v55 = vadd.f32 %v953_v52, %v913_v51 }
 0x150   :  { %v955_v56 = vpop.f32.mrf.mxu0 }
 0x151   :  { %v996_v57 = vpop.f32.mrf.mxu1  ;;  %v995_v58 = vadd.f32 %v994_v53, %v954_v55  ;;  %v956_v59 = vadd.f32 %v955_v56, %v915_v54 }
 0x152   :  { %v957_v60 = vpop.f32.mrf.mxu0 }
 0x153   :  { %v998_v61 = vpop.f32.mrf.mxu1  ;;  %v997_v62 = vadd.f32 %v996_v57, %v956_v59  ;;  %v1001_v63 = vmax.f32 %v995_v58, 0.0 }
 0x154   :  { %v958_v0 = vpop.f32.mrf.mxu0 }
 0x155   :  { %v999_v1 = vpop.f32.mrf.mxu1  ;;  %v1002_v2 = vmax.f32 %v997_v62, 0.0  ;;  %v1003_v4 = vpack.c.bf16 %v1001_v63, %v1001_v63 }
 0x157   :  { %v1004_v3 = vpack.c.bf16 %v1002_v2, %v1002_v2 }
 0x159   :  { %1172 = vmatprep.mubr.bf16.mxu0 %v1004_v3 }
 0x15a   :  { %1173 = vmatmul.mubr.bf16.vlgmr.msra.gmra.mxu0 %v1003_v4 }
 0x21a   :  { %v1439_v8 = vpop.f32.mrf.mxu0 }
 0x21c   :  { %v1440_v10 = vpop.f32.mrf.mxu0 }
 0x21d   :  { %v1441_v11 = vadd.f32 %v1440_v10, %v1439_v8 }
 0x21e   :  { %v1442_v12 = vpop.f32.mrf.mxu0 }
 0x21f   :  { %v1175_v13 = vadd.f32 %v1441_v11, %v1400_v9 }
 0x220   :  { %v1443_v14 = vpop.f32.mrf.mxu0 }
 0x221   :  { %v1180_v15 = vmax.f32 %v1175_v13, 0.0 }
 0x223   :  { %v1181_v16 = vpack.c.bf16 %v1180_v15, %v1180_v15 }
 0x225   :  { %1459 = vmatmul.mubr.msk.bf16.vlgmr.msra.gmra.mxu1 %vm1221_vm1, %v1181_v16 }
 0x2e5   :  { %v1259_v18 = vpop.f32.mrf.mxu1 }
 0x2e6   :  { %v1260_v19 = vadd.f32 %v1417_v17, %v1259_v18 }
 0x2e7   :  { %v1460_v20 = vpop.f32.mrf.mxu1 }
 0x2e8   :  { %v1265_v21 = vpack.c.bf16 %v1260_v19, %v1260_v19 }
 0x2e9   :  { %v1262_v22 = vpop.f32.mrf.mxu1 }
 0x2ea   :  { %1266 = vst [vmem:[%s1852_s7] sm:$0xf] %v1265_v21 }
 0x2eb   :  { %v1461_v23 = vpop.f32.mrf.mxu1 }
 0x2ec   :  { %1271 = vsyncpa [#allocation3], 1 }

</bundles_post_ra>
